<compile_context>
chip_gen: v6e
topology: v6e:2x2x1
jax: 0.10.0
libtpu: 0.0.40
codegen_flags: <defaults>
</compile_context>

<pallas_src>
import itertools
import numpy as np

import jax
import jax.numpy as jnp
from jax.experimental import pallas as pl
from jax.experimental.pallas import tpu as pltpu


def compute_cost_matrix(logits, onehot_t, obox, tboxT,
                        w_class: float, w_bbox: float, w_giou: float,
                        tile_n: int, tile_m: int):
    """Pallas kernel: w_bbox*L1 + w_class*(-softmax gather) + w_giou*(-GIoU)."""
    Np, Cp = logits.shape
    Mp = tboxT.shape[1]
    assert Np % tile_n == 0 and Mp % tile_m == 0
    assert tile_n % 8 == 0 and tile_m % 128 == 0 and Cp % 8 == 0

    w_class = float(w_class)
    w_bbox = float(w_bbox)
    w_giou = float(w_giou)

    def kernel(logits_ref, onehot_ref, obox_ref, tboxT_ref, c_ref):
        # --- softmax over classes (padded class columns hold -1e9 -> exp ~ 0) ---
        lg = logits_ref[...].astype(jnp.float32)                       # [TN, Cp]
        m = jnp.max(lg, axis=-1, keepdims=True)
        e = jnp.exp(lg - m)                                            # [TN, Cp]
        s = jnp.sum(e, axis=-1, keepdims=True)                         # [TN, 1]
        inv_s = pl.reciprocal(s, approx=False)                         # exact, tiny column

        # Fold normalization + class weight into the small [TN, Cp] LHS in f32,
        # then cast to bf16 for the MXU one-hot gather. Avoids a [TN, TM]
        # broadcast multiply on the output.
        lhs = ((-w_class) * inv_s * e).astype(jnp.bfloat16)            # [TN, Cp]
        class_cost = jnp.dot(lhs, onehot_ref[...],
                             preferred_element_type=jnp.float32)       # [TN, TM]

        # --- pairwise box terms ---
        ob = obox_ref[...].astype(jnp.float32)                         # [TN, 4]
        tb = tboxT_ref[...].astype(jnp.float32)                        # [4, TM]
        ox0, oy0 = ob[:, 0:1], ob[:, 1:2]                              # [TN, 1]
        ox1, oy1 = ob[:, 2:3], ob[:, 3:4]
        tx0, ty0 = tb[0:1, :], tb[1:2, :]                              # [1, TM]
        tx1, ty1 = tb[2:3, :], tb[3:4, :]

        # Hoisted pairwise min/max, reused by the L1 term, the intersection and
        # the enclosing box.
        min_x0 = jnp.minimum(ox0, tx0); max_x0 = jnp.maximum(ox0, tx0)
        min_y0 = jnp.minimum(oy0, ty0); max_y0 = jnp.maximum(oy0, ty0)
        min_x1 = jnp.minimum(ox1, tx1); max_x1 = jnp.maximum(ox1, tx1)
        min_y1 = jnp.minimum(oy1, ty1); max_y1 = jnp.maximum(oy1, ty1)

        # cost_bbox = torch.cdist(out_bbox, tgt_bbox, p=1): |a-b| = max - min
        cost_bbox = ((max_x0 - min_x0) + (max_y0 - min_y0)
                     + (max_x1 - min_x1) + (max_y1 - min_y1))          # [TN, TM]

        # cost_giou = -generalized_box_iou(out_bbox, tgt_bbox)
        area1 = (ox1 - ox0) * (oy1 - oy0)                              # [TN, 1]
        area2 = (tx1 - tx0) * (ty1 - ty0)                              # [1, TM]
        iw = jnp.maximum(min_x1 - max_x0, 0.0)
        ih = jnp.maximum(min_y1 - max_y0, 0.0)
        inter = iw * ih                                                # [TN, TM]
        union = area1 + area2 - inter
        # Enclosing-box extents are >= 0 for valid (and zero-padded) boxes, so
        # the reference's clamp(min=0) is a no-op here and is dropped.
        enclose = (max_x1 - min_x0) * (max_y1 - min_y0)
        # eps only guards exact zeros from padded boxes; near-degenerate real
        # boxes behave like the unguarded reference.
        eps = jnp.float32(1e-12)
        r_u = pl.reciprocal(union + eps, approx=True)                  # EUP
        r_e = pl.reciprocal(enclose + eps, approx=True)                # EUP
        giou = inter * r_u - (enclose - union) * r_e

        # fused final blend (class weight already folded into class_cost)
        c_ref[...] = w_bbox * cost_bbox + class_cost - w_giou * giou

    grid = (Np // tile_n, Mp // tile_m)
    return pl.pallas_call(
        kernel,
        out_shape=jax.ShapeDtypeStruct((Np, Mp), jnp.float32),
        grid=grid,
        in_specs=[
            pl.BlockSpec((tile_n, Cp), lambda i, j: (i, 0)),   # logits row tile
            pl.BlockSpec((Cp, tile_m), lambda i, j: (0, j)),   # one-hot col tile
            pl.BlockSpec((tile_n, 4), lambda i, j: (i, 0)),    # pred boxes row tile
            pl.BlockSpec((4, tile_m), lambda i, j: (0, j)),    # target boxes col tile
        ],
        out_specs=pl.BlockSpec((tile_n, tile_m), lambda i, j: (i, j)),
        compiler_params=pltpu.CompilerParams(
            dimension_semantics=("parallel", "parallel"),
            vmem_limit_bytes=40 * 1024 * 1024),
    )(logits, onehot_t, obox, tboxT)


def linear_sum_assignment_bruteforce(c):
    """Exact min-cost assignment for small matrices.
    Stand-in for scipy.optimize.linear_sum_assignment (host-side, sequential).
    """
    # TODO(synk): replace with a Jonker-Volgenant / scipy solver for real DETR
    # sizes; brute force is factorial in the number of targets.
    c = np.asarray(c, dtype=np.float64)
    n_rows, n_cols = c.shape
    transposed = False
    if n_cols > n_rows:
        c = c.T
        n_rows, n_cols = c.shape
        transposed = True
    best_cost, best_rows = None, None
    for rows in itertools.permutations(range(n_rows), n_cols):
        cost = sum(c[r, j] for j, r in enumerate(rows))
        if best_cost is None or cost < best_cost:
            best_cost, best_rows = cost, rows
    work_rows = np.asarray(best_rows, dtype=np.int64)
    work_cols = np.arange(n_cols, dtype=np.int64)
    if transposed:
        rows, cols = work_cols, work_rows
    else:
        rows, cols = work_rows, work_cols
    order = np.argsort(rows)
    return rows[order], cols[order]


def _round_up(x, m):
    return ((x + m - 1) // m) * m


def hungarian_matcher_forward(pred_logits, pred_boxes, tgt_labels_list, tgt_boxes_list,
                              n_classes, cost_class=1.0, cost_bbox=1.0, cost_giou=1.0):
    bs, nq, C = pred_logits.shape
    N = bs * nq
    out_logits = pred_logits.reshape(N, C).astype(jnp.float32)
    out_bbox = pred_boxes.reshape(N, 4).astype(jnp.float32)

    tgt_ids = jnp.concatenate(tgt_labels_list)                         # [M]
    tgt_bbox = jnp.concatenate(tgt_boxes_list, axis=0)                 # [M, 4]
    M = int(tgt_ids.shape[0])

    # --- pad M (lane axis) to a multiple of 128; tile it if large ---
    Mp128 = max(128, _round_up(M, 128))
    tile_m = min(1024, Mp128)
    Mp = _round_up(Mp128, tile_m)

    # --- pad the class axis to a multiple of 128 for an aligned MXU contraction.
    # Padded logits get -1e9 so exp underflows to 0 and the softmax is unchanged;
    # padded target-id columns get -1 so their one-hot column is all zeros.
    Cp = max(128, _round_up(C, 128))
    ids_p = jnp.full((Mp,), -1, jnp.int32).at[:M].set(tgt_ids.astype(jnp.int32))
    onehot_t = (jnp.arange(Cp, dtype=jnp.int32)[:, None]
                == ids_p[None, :]).astype(jnp.bfloat16)                         # [Cp, Mp]
    tboxT = jnp.zeros((4, Mp), jnp.float32).at[:, :M].set(
        tgt_bbox.T.astype(jnp.float32))                                         # [4, Mp]

    # --- pad N (sublane axis); force >= 2 row tiles so v7x megacore can shard ---
    Np8 = _round_up(N, 8)
    if Np8 <= 8:
        tile_n = 8
    else:
        tile_n = min(512, _round_up(-(-Np8 // 2), 8))
    Np = _round_up(N, tile_n)
    logits_p = jnp.full((Np, Cp), -1e9, jnp.float32).at[:N, :C].set(out_logits)
    obox_p = jnp.zeros((Np, 4), jnp.float32).at[:N].set(out_bbox)

    Cmat = compute_cost_matrix(logits_p, onehot_t, obox_p, tboxT,
                               float(cost_class), float(cost_bbox), float(cost_giou),
                               tile_n, tile_m)[:N, :M]
    Cmat = Cmat.reshape(bs, nq, M)

    # TODO(synk): the Hungarian assignment itself (scipy linear_sum_assignment)
    # is a sequential combinatorial algorithm with no clean Pallas equivalent;
    # it is done on host, as in the reference (which also calls .cpu()).
    Cnp = np.asarray(jax.device_get(Cmat))
    sizes = [int(b.shape[0]) for b in tgt_boxes_list]
    indices = []
    offset = 0
    for i, sz in enumerate(sizes):
        row, col = linear_sum_assignment_bruteforce(Cnp[i, :, offset:offset + sz])
        indices.append((row.astype(np.int64), col.astype(np.int64)))
        offset += sz

    # _get_src_permutation_idx
    batch_idx = np.concatenate([np.full_like(src, i) for i, (src, _) in enumerate(indices)])
    src_idx = np.concatenate([src for src, _ in indices])
    idx = (batch_idx, src_idx)

    target_classes_o = np.concatenate(
        [np.asarray(jax.device_get(t))[J] for t, (_, J) in zip(tgt_labels_list, indices)])
    target_classes = np.full((bs, nq), n_classes, dtype=np.int64)
    target_classes[idx] = target_classes_o
    return target_classes, indices, idx, Cmat


if __name__ == "__main__":
    key = jax.random.PRNGKey(0)
    bs, nq, n_classes = 2, 8, 8
    k1, k2, k3, k4 = jax.random.split(key, 4)

    pred_logits = jax.random.normal(k1, (bs, nq, n_classes), dtype=jnp.float32)

    def rand_boxes(k, n):
        # boxes in [x0, y0, x1, y1] with x1 > x0, y1 > y0 (matches reference format)
        xy = jax.random.uniform(k, (n, 2), minval=0.0, maxval=0.5)
        wh = jax.random.uniform(jax.random.fold_in(k, 1), (n, 2), minval=0.1, maxval=0.4)
        return jnp.concatenate([xy, xy + wh], axis=-1).astype(jnp.float32)

    pred_boxes = rand_boxes(k2, bs * nq).reshape(bs, nq, 4)

    sizes = [3, 5]  # num target boxes per batch element
    tgt_labels_list = [jax.random.randint(jax.random.fold_in(k3, i), (s,), 0, n_classes)
                       for i, s in enumerate(sizes)]
    tgt_boxes_list = [rand_boxes(jax.random.fold_in(k4, i), s) for i, s in enumerate(sizes)]

    target_classes, indices, idx, Cmat = hungarian_matcher_forward(
        pred_logits, pred_boxes, tgt_labels_list, tgt_boxes_list,
        n_classes=n_classes, cost_class=1.0, cost_bbox=1.0, cost_giou=1.0)

    jax.block_until_ready(Cmat)
    assert target_classes.shape == (bs, nq)
    assert Cmat.shape == (bs, nq, sum(sizes))
    assert all(len(i) == len(j) == s for (i, j), s in zip(indices, sizes))
    assert np.all(np.isfinite(np.asarray(Cmat)))
    print("KERNEL_OK")
</pallas_src>

<mosaic_0001>
module attributes {stable_mosaic.version = 11 : i64} {
  func.func @kernel(%arg0: i32, %arg1: i32, %arg2: memref<8x128xf32, #tpu.memory_space<vmem>>, %arg3: memref<128x128xbf16, #tpu.memory_space<vmem>>, %arg4: memref<8x4xf32, #tpu.memory_space<vmem>>, %arg5: memref<4x128xf32, #tpu.memory_space<vmem>>, %arg6: memref<8x128xf32, #tpu.memory_space<vmem>>) attributes {dimension_semantics = [#tpu.dimension_semantics<parallel>, #tpu.dimension_semantics<parallel>], iteration_bounds = array<i64: 2, 1>, scalar_prefetch = 0 : i64, scratch_operands = 0 : i64, tpu.core_type = #tpu.core_type<tc>, window_params = [{transform_indices = @transform_0, window_bounds = array<i64: 8, 128>}, {transform_indices = @transform_1, window_bounds = array<i64: 128, 128>}, {transform_indices = @transform_2, window_bounds = array<i64: 8, 4>}, {transform_indices = @transform_3, window_bounds = array<i64: 4, 128>}, {transform_indices = @transform_4, window_bounds = array<i64: 8, 128>}]} {
    %c0 = arith.constant 0 : index
    %c0_0 = arith.constant 0 : index
    %0 = vector.load %arg2[%c0, %c0_0] : memref<8x128xf32, #tpu.memory_space<vmem>>, vector<8x128xf32>
    %cst = arith.constant dense<0xFF800000> : vector<8xf32>
    %1 = vector.multi_reduction <maximumf>, %0, %cst [1] : vector<8x128xf32> to vector<8xf32>
    %2 = vector.shape_cast %1 : vector<8xf32> to vector<8x1xf32>
    %3 = vector.broadcast %2 : vector<8x1xf32> to vector<8x128xf32>
    %4 = arith.subf %0, %3 : vector<8x128xf32>
    %5 = math.exp %4 : vector<8x128xf32>
    %cst_1 = arith.constant dense<0.000000e+00> : vector<8xf32>
    %6 = vector.multi_reduction <add>, %5, %cst_1 [1] : vector<8x128xf32> to vector<8xf32>
    %7 = vector.shape_cast %6 : vector<8xf32> to vector<8x1xf32>
    %8 = tpu.reciprocal %7 : vector<8x1xf32> -> vector<8x1xf32>
    %cst_2 = arith.constant -1.000000e+00 : f32
    %9 = vector.broadcast %cst_2 : f32 to vector<8x1xf32>
    %10 = arith.mulf %9, %8 : vector<8x1xf32>
    %11 = vector.broadcast %10 : vector<8x1xf32> to vector<8x128xf32>
    %12 = arith.mulf %11, %5 : vector<8x128xf32>
    %13 = arith.truncf %12 : vector<8x128xf32> to vector<8x128xbf16>
    %c0_3 = arith.constant 0 : index
    %c0_4 = arith.constant 0 : index
    %14 = vector.load %arg3[%c0_3, %c0_4] : memref<128x128xbf16, #tpu.memory_space<vmem>>, vector<128x128xbf16>
    %cst_5 = arith.constant dense<0.000000e+00> : vector<8x128xf32>
    %15 = tpu.matmul %13, %14, %cst_5 {dimension_numbers = #tpu.dot_dimension_numbers<[1], [0], [0], [1], [0, 0, 1, 1], [], []>} : vector<8x128xbf16>, vector<128x128xbf16>, vector<8x128xf32> -> vector<8x128xf32>
    %c0_6 = arith.constant 0 : index
    %c0_7 = arith.constant 0 : index
    %16 = vector.load %arg4[%c0_6, %c0_7] : memref<8x4xf32, #tpu.memory_space<vmem>>, vector<8x4xf32>
    %c0_8 = arith.constant 0 : index
    %c0_9 = arith.constant 0 : index
    %17 = vector.load %arg5[%c0_8, %c0_9] : memref<4x128xf32, #tpu.memory_space<vmem>>, vector<4x128xf32>
    %18 = vector.extract_strided_slice %16 {offsets = [0, 0], sizes = [8, 1], strides = [1, 1]} : vector<8x4xf32> to vector<8x1xf32>
    %19 = vector.extract_strided_slice %16 {offsets = [0, 1], sizes = [8, 1], strides = [1, 1]} : vector<8x4xf32> to vector<8x1xf32>
    %20 = vector.extract_strided_slice %16 {offsets = [0, 2], sizes = [8, 1], strides = [1, 1]} : vector<8x4xf32> to vector<8x1xf32>
    %21 = vector.extract_strided_slice %16 {offsets = [0, 3], sizes = [8, 1], strides = [1, 1]} : vector<8x4xf32> to vector<8x1xf32>
    %22 = vector.extract_strided_slice %17 {offsets = [0, 0], sizes = [1, 128], strides = [1, 1]} : vector<4x128xf32> to vector<1x128xf32>
    %23 = vector.extract_strided_slice %17 {offsets = [1, 0], sizes = [1, 128], strides = [1, 1]} : vector<4x128xf32> to vector<1x128xf32>
    %24 = vector.extract_strided_slice %17 {offsets = [2, 0], sizes = [1, 128], strides = [1, 1]} : vector<4x128xf32> to vector<1x128xf32>
    %25 = vector.extract_strided_slice %17 {offsets = [3, 0], sizes = [1, 128], strides = [1, 1]} : vector<4x128xf32> to vector<1x128xf32>
    %26 = vector.broadcast %18 : vector<8x1xf32> to vector<8x128xf32>
    %27 = vector.broadcast %22 : vector<1x128xf32> to vector<8x128xf32>
    %28 = arith.minimumf %26, %27 : vector<8x128xf32>
    %29 = vector.broadcast %18 : vector<8x1xf32> to vector<8x128xf32>
    %30 = vector.broadcast %22 : vector<1x128xf32> to vector<8x128xf32>
    %31 = arith.maximumf %29, %30 : vector<8x128xf32>
    %32 = vector.broadcast %19 : vector<8x1xf32> to vector<8x128xf32>
    %33 = vector.broadcast %23 : vector<1x128xf32> to vector<8x128xf32>
    %34 = arith.minimumf %32, %33 : vector<8x128xf32>
    %35 = vector.broadcast %19 : vector<8x1xf32> to vector<8x128xf32>
    %36 = vector.broadcast %23 : vector<1x128xf32> to vector<8x128xf32>
    %37 = arith.maximumf %35, %36 : vector<8x128xf32>
    %38 = vector.broadcast %20 : vector<8x1xf32> to vector<8x128xf32>
    %39 = vector.broadcast %24 : vector<1x128xf32> to vector<8x128xf32>
    %40 = arith.minimumf %38, %39 : vector<8x128xf32>
    %41 = vector.broadcast %20 : vector<8x1xf32> to vector<8x128xf32>
    %42 = vector.broadcast %24 : vector<1x128xf32> to vector<8x128xf32>
    %43 = arith.maximumf %41, %42 : vector<8x128xf32>
    %44 = vector.broadcast %21 : vector<8x1xf32> to vector<8x128xf32>
    %45 = vector.broadcast %25 : vector<1x128xf32> to vector<8x128xf32>
    %46 = arith.minimumf %44, %45 : vector<8x128xf32>
    %47 = vector.broadcast %21 : vector<8x1xf32> to vector<8x128xf32>
    %48 = vector.broadcast %25 : vector<1x128xf32> to vector<8x128xf32>
    %49 = arith.maximumf %47, %48 : vector<8x128xf32>
    %50 = arith.subf %31, %28 : vector<8x128xf32>
    %51 = arith.subf %37, %34 : vector<8x128xf32>
    %52 = arith.addf %50, %51 : vector<8x128xf32>
    %53 = arith.subf %43, %40 : vector<8x128xf32>
    %54 = arith.addf %52, %53 : vector<8x128xf32>
    %55 = arith.subf %49, %46 : vector<8x128xf32>
    %56 = arith.addf %54, %55 : vector<8x128xf32>
    %57 = arith.subf %20, %18 : vector<8x1xf32>
    %58 = arith.subf %21, %19 : vector<8x1xf32>
    %59 = arith.mulf %57, %58 : vector<8x1xf32>
    %60 = arith.subf %24, %22 : vector<1x128xf32>
    %61 = arith.subf %25, %23 : vector<1x128xf32>
    %62 = arith.mulf %60, %61 : vector<1x128xf32>
    %63 = arith.subf %40, %31 : vector<8x128xf32>
    %cst_10 = arith.constant 0.000000e+00 : f32
    %64 = vector.broadcast %cst_10 : f32 to vector<8x128xf32>
    %65 = arith.maximumf %63, %64 : vector<8x128xf32>
    %66 = arith.subf %46, %37 : vector<8x128xf32>
    %cst_11 = arith.constant 0.000000e+00 : f32
    %67 = vector.broadcast %cst_11 : f32 to vector<8x128xf32>
    %68 = arith.maximumf %66, %67 : vector<8x128xf32>
    %69 = arith.mulf %65, %68 : vector<8x128xf32>
    %70 = vector.broadcast %59 : vector<8x1xf32> to vector<8x128xf32>
    %71 = vector.broadcast %62 : vector<1x128xf32> to vector<8x128xf32>
    %72 = arith.addf %70, %71 : vector<8x128xf32>
    %73 = arith.subf %72, %69 : vector<8x128xf32>
    %74 = arith.subf %43, %28 : vector<8x128xf32>
    %75 = arith.subf %49, %34 : vector<8x128xf32>
    %76 = arith.mulf %74, %75 : vector<8x128xf32>
    %cst_12 = arith.constant 9.99999996E-13 : f32
    %77 = vector.broadcast %cst_12 : f32 to vector<8x128xf32>
    %78 = arith.addf %73, %77 : vector<8x128xf32>
    %79 = tpu.reciprocal %78 {approx = true} : vector<8x128xf32> -> vector<8x128xf32>
    %cst_13 = arith.constant 9.99999996E-13 : f32
    %80 = vector.broadcast %cst_13 : f32 to vector<8x128xf32>
    %81 = arith.addf %76, %80 : vector<8x128xf32>
    %82 = tpu.reciprocal %81 {approx = true} : vector<8x128xf32> -> vector<8x128xf32>
    %83 = arith.mulf %69, %79 : vector<8x128xf32>
    %84 = arith.subf %76, %73 : vector<8x128xf32>
    %85 = arith.mulf %84, %82 : vector<8x128xf32>
    %86 = arith.subf %83, %85 : vector<8x128xf32>
    %cst_14 = arith.constant 1.000000e+00 : f32
    %87 = vector.broadcast %cst_14 : f32 to vector<8x128xf32>
    %88 = arith.mulf %87, %56 : vector<8x128xf32>
    %89 = arith.addf %88, %15 : vector<8x128xf32>
    %cst_15 = arith.constant 1.000000e+00 : f32
    %90 = vector.broadcast %cst_15 : f32 to vector<8x128xf32>
    %91 = arith.mulf %90, %86 : vector<8x128xf32>
    %92 = arith.subf %89, %91 : vector<8x128xf32>
    %c0_16 = arith.constant 0 : index
    %c0_17 = arith.constant 0 : index
    %93 = vector.load %arg6[%c0_16, %c0_17] : memref<8x128xf32, #tpu.memory_space<vmem>>, vector<8x128xf32>
    tpu.vector_store %arg6[%c0_16, %c0_17], %92 {strides = array<i32>} : memref<8x128xf32, #tpu.memory_space<vmem>>, vector<8x128xf32>,
    return
  }
  func.func @transform_0(%arg0: i32, %arg1: i32) -> (i32, i32) {
    %c0_i32 = arith.constant 0 : i32
    %c0_i32_0 = arith.constant 0 : i32
    return %arg0, %c0_i32 : i32, i32
  }
  func.func @transform_1(%arg0: i32, %arg1: i32) -> (i32, i32) {
    %c0_i32 = arith.constant 0 : i32
    %c0_i32_0 = arith.constant 0 : i32
    return %c0_i32, %arg1 : i32, i32
  }
  func.func @transform_2(%arg0: i32, %arg1: i32) -> (i32, i32) {
    %c0_i32 = arith.constant 0 : i32
    %c0_i32_0 = arith.constant 0 : i32
    return %arg0, %c0_i32 : i32, i32
  }
  func.func @transform_3(%arg0: i32, %arg1: i32) -> (i32, i32) {
    %c0_i32 = arith.constant 0 : i32
    %c0_i32_0 = arith.constant 0 : i32
    return %c0_i32, %arg1 : i32, i32
  }
  func.func @transform_4(%arg0: i32, %arg1: i32) -> (i32, i32) {
    %c0_i32 = arith.constant 0 : i32
    return %arg0, %arg1 : i32, i32
  }
}

</mosaic_0001>

<bundles_post_ra>
// kernel: tpu_custom_call.1
= control target key start
LH: loop header
LB: loop body
LE: loop exit
PB: predicated region body
PF: predicated region fallthrough
CT: control target
= control target key end

     0   :  { %9 = vsyncpa [#allocation3], 0  ;;  %s1034_s0 = inlined_call_operand.vmem [shape: f32[16,128], index: 0, kind: input, shape index: {}]   ;;  %s1035_s1 = inlined_call_operand.hbm [shape: bf16[128,128], index: 1, kind: input, shape index: {}]   ;;  %s1036_s2 = inlined_call_operand.vmem [shape: f32[16,4], index: 2, kind: input, shape index: {}]   ;;  %s1037_s3 = inlined_call_operand.vmem [shape: f32[4,128], index: 3, kind: input, shape index: {}]   ;;  %s1038_s4 = inlined_call_operand.hbm [shape: f32[16,128], index: 4, kind: output, shape index: {}]  }
   0x1   :  { %10 = vsyncpa [#allocation4], 0 }
   0x2   :  { %12 = vsyncpa [#allocation4 + $0x1], 0  ;;  %s896_s15 = smov 0   ;;  %s898_s16 = smov 0  }
   0x3   :  { %s900_s17 = smov 0   ;;  %s902_s18 = smov 0  }
   0x4   :  { %s904_s19 = smov 0   ;;  %s906_s20 = smov 0  }
   0x5 LB: > { %s601_s21 = sadd.s32 4294967295, %s857_s20   ;;  %s602_s22 = sadd.s32 4294967294, %s857_s20   ;;  %s857_s20 = sphi %s906_s20, %s18_s20   ;;  %s853_s19 = sphi %s904_s19, %s1047_s19   ;;  %s849_s18 = sphi %s902_s18, %s1046_s18   ;;  %s845_s17 = sphi %s900_s17, %s1045_s17   ;;  %s841_s16 = sphi %s898_s16, %s1044_s16   ;;  %s837_s15 = sphi %s896_s15, %s1043_s15  }
   0x6   : > { %s30_s23 = sadd.s32 1, %s853_s19  ;;  %s143_s24 = sadd.s32 1, %s845_s17 }
   0x7   : > { %p32_p0 = scmp.ge.s32.totalorder %s30_s23, 2  ;;  %p153_p1 = scmp.ne.s32.totalorder %s845_s17, %s841_s16 }
   0x8   : > { %p154_p2 = scmp.eq.s32.totalorder %s601_s21, 1  ;;  %p159_p3 = scmp.ne.s32.totalorder %s841_s16, %s837_s15 }
   0x9   : > { %s1049_s23 = smov (%p32_p0, %s30_s23), 0  ;;  %p160_p5 = scmp.eq.s32.totalorder %s602_s22, 1 }
   0xa   : > { %p936_p4 = por %p154_p2, %p153_p1  ;;  %s138_s26 = ssub.s32 %s853_s19, %s1049_s23 }
   0xb   : > { %p603_p6 = scmp.ge.s32.totalorder %s857_s20, 1  ;;  %p141_p7 = scmp.eq.s32.totalorder %s138_s26, 0 }
   0xc   : > { %p943_p8 = por %p160_p5, %p159_p3  ;;  %p167_p9 = scmp.lt.s32.totalorder %s857_s20, 3 }
   0xd   : > { %s949_s28 = scalar_select %p141_p7, %s845_s17, %s143_s24  }
   0xe   : > { %p951_p10 = pnand %p603_p6, %p167_p9  ;;  %p955_p11 = scmp.eq.s32.totalorder %s601_s21, 0 }
   0xf   : > { %s859_s5 = smov [#allocation2]  }
  0x10   : > { %p659_p12 = pneg %p951_p10  ;;  %s181_s6 = sshll.u32 %s859_s5, 4  ;;  %s182_s6 = int_to_ptr.vmem [resolvable:$true] %s181_s6 }
  0x11   : > { %s762_s7 = scalar_lea.vmem %s182_s6, 1024  ;;  %p770_p5 = scmp.lt.s32.totalorder %s182_s6, %s182_s6 }
  0x12   : > { %p660_p13 = pnand %p955_p11, %p659_p12  ;;  %p763_p1 = scmp.ne.s32.totalorder %s182_s6, %s762_s7 }
  0x13   : > { %p771_p6 = scmp.lt.s32.totalorder %s762_s7, %s762_s7 }
  0x14   : > { %p753_p0 = pneg %p660_p13 }
  0x15   : > { %p772_p7 = por %p771_p6, %p770_p5 }
  0x16   : > { %p765_p2 = pnand %p763_p1, %p753_p0 }
  0x18   : > { %p766_p3 = pneg %p765_p2 }
  0x1a   : > { %p773_p9 = pnand %p772_p7, %p766_p3 }
  0x1c   : > { %776 = shalt.err (!%p773_p9)
}
  0x1d   : > { %s860_s8 = smov 64   ;;  %s861_s9 = smov 4  }
  0x1e   : > { %662 = dma.hbm_to_vmem [thread:$0]  (!%p660_p13), %s1035_s1, 1024, %s182_s6, [#allocation3], %s860_s8, %s860_s8, %s861_s9  }
  0x1f   : > { %218 = sbr.rel (%p951_p10) target bundleno = 570 (0x23a), region = 36 }
  0x24   : > { %828 = dma.done.wait (%p955_p11), [#allocation3], 1024  }
  0x25   : > { %830 = vsyncadd (%p955_p11), [#allocation3], 4294966272  ;;  %p251_p12 = scmp.lt.s32.totalorder %s849_s18, 1  ;;  %s862_s5 = smov 2   ;;  %v863_v2 = vmov 1   ;;  %v864_v3 = vmov 0   ;;  %v387_v28 = vlaneseq }
  0x26   : > { %730 = vset.pattern.permute.xlu1 %v863_v2  ;;  %729 = vset.pattern.permute.xlu0 %v864_v3  ;;  %v735_v4 = vld [vmem:[#allocation2 + $0x38] sm:$0xff]   ;;  %v865_v5 = vmov 0.0   ;;  %v736_v6 = vld [vmem:[#allocation2 + $0x30] sm:$0xff]   ;;  %v737_v7 = vld [vmem:[#allocation2 + $0x28] sm:$0xff]   ;;  %s866_s30 = smov 127   ;;  %v867_v10 = vmov 2  }
  0x27   : > { %s252_s12 = scalar_select %p251_p12, %s849_s18, 1  ;;  %633 = vmatprep.subr.bf16.mxu0 %v865_v5  ;;  %v868_v11 = vmov 3   ;;  %v738_v16 = vld [vmem:[#allocation2 + $0x20] sm:$0xff]   ;;  %v739_v17 = vld [vmem:[#allocation2 + $0x18] sm:$0xff]   ;;  %v740_v18 = vld [vmem:[#allocation2 + $0x10] sm:$0xff]   ;;  %vm869_vm0 = vmmov 0  }
  0x28   : > { %634 = vmatpush3.bf16.msra.mxu0 %v735_v4  ;;  %v741_v19 = vld [vmem:[#allocation2 + $0x8] sm:$0xff]   ;;  %v742_v20 = vld [vmem:[#allocation2] sm:$0xff]   ;;  %649 = vmatprep.mubr.msk.bf16.mxu0 %vm869_vm0, %v865_v5  ;;  %v388_v31 = vshrl.u32 %v387_v28, 7  ;;  %s248_s8 = sand.u32 1, %s841_s16   ;;  %s621_s10 = sshll.u32 %s849_s18, 7 }
  0x29   : > { %s610_s13 = sshll.u32 %s252_s12, 3  ;;  %635 = vmatprep.subr.bf16.mxu0 %v865_v5  ;;  %v381_v30 = vld [vmem:[%s1037_s3] sm:$0xf]  ;;  %s609_s9 = sshll.u32 %s248_s8, 3 }
  0x2a   : > { %s258_s22 = scalar_lea.vmem %s1036_s2, %s610_s13  ;;  %s254_s29 = scalar_lea.vmem %s1034_s0, %s610_s13  ;;  %v440_v33 = vrot.slane %v381_v30, 6  ;;  %v399_v34 = vsub.s32 1, %v388_v31  ;;  %v409_v35 = vsub.s32 2, %v388_v31  ;;  %v419_v36 = vsub.s32 3, %v388_v31 }
  0x2b   : > { %v380_v0 = vld [vmem:[%s258_s22] sm:$0xff]  ;;  %v389_v37 = vsub.s32 0, %v388_v31  ;;  %s250_s11 = scalar_lea.vmem [#allocation5], %s609_s9  ;;  %s988_s21 = scalar_lea.hbm %s1038_s4, %s621_s10 }
  0x2c   : > { %v264_v1 = vld [vmem:[%s254_s29] sm:$0xff]  ;;  %430 = vrot.lane.b32.xlu1 %v380_v0, %s862_s5  ;;  %636 = vmatpush3.bf16.msra.mxu0 %v736_v6  ;;  %v442_v38 = vsub.f32 %v381_v30, %v440_v33  ;;  %v400_v39 = vrot.slane %v381_v30, %v399_v34  ;;  %v410_v40 = vrot.slane %v381_v30, %v409_v35  ;;  %s492_s12 = sshll.u32 %s250_s11, 4  ;;  %s478_s18 = scalar_lea.sflag [#allocation4], %s248_s8  ;;  %s990_s12 = int_to_ptr.vmem [resolvable:$true] %s492_s12 }
  0x2d   : > { %265 = vmax.xlane.f32.xlu0 %v264_v1  ;;  %637 = vmatprep.subr.bf16.mxu0 %v865_v5  ;;  %v420_v41 = vrot.slane %v381_v30, %v419_v36  ;;  %v390_v42 = vrot.slane %v381_v30, %v389_v37  ;;  %s777_s22 = scalar_lea.vmem %s990_s12, 128  ;;  %s870_s24 = smov [#allocation5]  }
  0x2e   : > { %v444_v45 = vrot.slane %v442_v38, 1  ;;  %p778_p10 = scmp.ne.s32.totalorder %s990_s12, %s777_s22  ;;  %s781_s26 = sshll.u32 %s870_s24, 4  ;;  %s782_s26 = int_to_ptr.vmem [resolvable:$false] %s781_s26 }
  0x2f   : > { %s783_s29 = scalar_lea.vmem %s782_s26, 256  ;;  %p784_p0 = scmp.lt.s32.totalorder %s990_s12, %s782_s26 }
  0x30   : > { %638 = vmatpush3.bf16.msra.mxu0 %v737_v7  ;;  %v446_v52 = vmul.f32 %v444_v45, %v442_v38  ;;  %p779_p11 = pnand %p778_p10, %p936_p4  ;;  %p785_p1 = scmp.lt.s32.totalorder %s783_s29, %s777_s22 }
  0x31   : > { %639 = vmatprep.subr.bf16.mxu0 %v865_v5 }
  0x32   : > { %v460_v55 = vrot.slane %v446_v52, %v409_v35  ;;  %p780_p13 = pneg %p779_p11  ;;  %p786_p2 = por %p785_p1, %p784_p0 }
  0x34   : > { %640 = vmatpush3.bf16.msra.mxu0 %v738_v16  ;;  %p787_p3 = pnand %p786_p2, %p780_p13 }
  0x35   : > { %641 = vmatprep.subr.bf16.mxu0 %v865_v5 }
  0x38   : > { %642 = vmatpush3.bf16.msra.mxu0 %v739_v17 }
  0x39   : > { %643 = vmatprep.subr.bf16.mxu0 %v865_v5 }
  0x3c   : > { %644 = vmatpush3.bf16.msra.mxu0 %v740_v18 }
  0x3d   : > { %645 = vmatprep.subr.bf16.mxu0 %v865_v5 }
  0x40   : > { %646 = vmatpush3.bf16.msra.mxu0 %v741_v19 }
  0x41   : > { %647 = vmatprep.subr.bf16.mxu0 %v865_v5 }
  0x44   : > { %648 = vmatpush3.bf16.msra.mxu0 %v742_v20 }
  0x9e   : > { %v431_v8 = vpop.permute.xlu1 %430 }
  0x9f   : > { %v433_v9 = vsub.f32 %v380_v0, %v431_v8 }
  0xa1   : > { %435 = vrot.lane.b32.xlu1 %v433_v9, %s866_s30 }
  0xa5   : > { %394 = vperm.xlu1 %730, %v380_v0  }
  0xa9   : > { %731 = vset.pattern.permute.xlu1 %v867_v10 }
  0xaa   : > { %404 = vperm.xlu1 %731, %v380_v0  }
  0xae   : > { %732 = vset.pattern.permute.xlu1 %v868_v11 }
  0xaf   : > { %414 = vperm.xlu1 %732, %v380_v0  }
  0xb3   : > { %733 = vset.pattern.permute.xlu1 %v867_v10 }
  0xb6   : > { %v266_v12 = vpop.xlane.xlu0 %265 }
  0xb7   : > { %v267_v13 = vsub.f32 %v264_v1, %v266_v12 }
  0xb9   : > { %v268_v14 = vmul.f32 1.442695, %v267_v13 }
  0xbb   : > { %743 = vpow2.f32 %v268_v14 }
  0xc8   : > { %v744_v15 = vpop.eup %743 }
  0xc9   : > { %270 = vadd.xlane.f32.xlu0 %v744_v15 }
  0xdf   : > { %384 = vperm.xlu0 %729, %v380_v0  }
  0xe3   : > { %734 = vset.pattern.permute.xlu0 %v867_v10 }
 0x113   : > { %v436_v21 = vpop.permute.xlu1 %435 }
 0x114   : > { %v438_v22 = vmul.f32 %v436_v21, %v433_v9 }
 0x116   : > { %454 = vperm.xlu1 %733, %v438_v22  }
 0x120   : > { %v395_v29 = vpop.permute.xlu1 %394 }
 0x121   : > { %v402_v46 = vmax.f32 %v395_v29, %v400_v39  ;;  %v401_v57 = vmin.f32 %v395_v29, %v400_v39 }
 0x123   : > { %v424_v5 = vsub.f32 %v402_v46, %v401_v57 }
 0x125   : > { %v405_v32 = vpop.permute.xlu1 %404 }
 0x126   : > { %v411_v47 = vmin.f32 %v405_v32, %v410_v40  ;;  %v412_v58 = vmax.f32 %v405_v32, %v410_v40 }
 0x128   : > { %v426_v7 = vsub.f32 %v412_v58, %v411_v47 }
 0x12a   : > { %v415_v43 = vpop.permute.xlu1 %414 }
 0x12b   : > { %v421_v48 = vmin.f32 %v415_v43, %v420_v41  ;;  %v422_v59 = vmax.f32 %v415_v43, %v420_v41 }
 0x12d   : > { %v449_v50 = vsub.f32 %v421_v48, %v402_v46  ;;  %v464_v63 = vsub.f32 %v422_v59, %v401_v57  ;;  %v428_v10 = vsub.f32 %v422_v59, %v421_v48 }
 0x12f   : > { %v450_v53 = vmax.f32 %v449_v50, 0.0 }
 0x152   : > { %v271_v23 = vpop.xlane.xlu0 %270 }
 0x153   : > { %745 = vrcp.f32 %v271_v23 }
 0x15a   : > { %v385_v44 = vpop.permute.xlu0 %384 }
 0x15b   : > { %v392_v49 = vmax.f32 %v385_v44, %v390_v42  ;;  %v391_v60 = vmin.f32 %v385_v44, %v390_v42 }
 0x15d   : > { %v447_v51 = vsub.f32 %v411_v47, %v392_v49  ;;  %v463_v0 = vsub.f32 %v412_v58, %v391_v60  ;;  %v423_v6 = vsub.f32 %v392_v49, %v391_v60 }
 0x15f   : > { %v448_v54 = vmax.f32 %v447_v51, 0.0  ;;  %v465_v2 = vmul.f32 %v464_v63, %v463_v0  ;;  %v425_v8 = vadd.f32 %v424_v5, %v423_v6 }
 0x160   : > { %v746_v24 = vpop.eup %745 }
 0x161   : > { %v273_v25 = vmul.f32 -1.0, %v746_v24  ;;  %v451_v61 = vmul.f32 %v450_v53, %v448_v54  ;;  %v468_v4 = vadd.f32 1e-12, %v465_v2  ;;  %v427_v12 = vadd.f32 %v426_v7, %v425_v8 }
 0x163   : > { %v274_v26 = vmul.f32 %v744_v15, %v273_v25  ;;  %v429_v15 = vadd.f32 %v428_v10, %v427_v12 }
 0x165   : > { %v275_v27 = vpack.c.bf16 %v274_v26, %v274_v26 }
 0x167   : > { %650 = vmatmul.mubr.bf16.vlgmr.msra.gmra.mxu0 %v275_v27 }
 0x191   : > { %v455_v56 = vpop.permute.xlu1 %454 }
 0x192   : > { %v461_v62 = vadd.f32 %v460_v55, %v455_v56 }
 0x194   : > { %v462_v1 = vsub.f32 %v461_v62, %v451_v61 }
 0x196   : > { %v466_v3 = vadd.f32 1e-12, %v462_v1  ;;  %v471_v11 = vsub.f32 %v465_v2, %v462_v1 }
 0x198   : > { %747 = vrcp.f32 %v466_v3 }
 0x199   : > { %749 = vrcp.f32 %v468_v4 }
 0x1a5   : > { %v748_v9 = vpop.eup %747 }
 0x1a6   : > { %v750_v13 = vpop.eup %749  ;;  %v470_v14 = vmul.f32 %v748_v9, %v451_v61 }
 0x1a7   : > { %v472_v16 = vmul.f32 %v750_v13, %v471_v11 }
 0x1a9   : > { %v473_v18 = vsub.f32 %v470_v14, %v472_v16 }
 0x227   : > { %v374_v17 = vpop.f32.mrf.mxu0 }
 0x228   : > { %v474_v19 = vadd.f32 %v429_v15, %v374_v17 }
 0x229   : > { %v651_v20 = vpop.f32.mrf.mxu0 }
 0x22a   : > { %v475_v21 = vsub.f32 %v474_v19, %v473_v18 }
 0x22b   : > { %v377_v22 = vpop.f32.mrf.mxu0 }
 0x22c   : > { %476 = vst [vmem:[%s250_s11] sm:$0xff] %v475_v21 }
 0x22d   : > { %v652_v23 = vpop.f32.mrf.mxu0 }
 0x22e   : > { %790 = shalt.err (!%p787_p3)
}
 0x22f   : > { %s791_s5 = scalar_lea.hbm %s988_s21, 128  ;;  %s795_s7 = scalar_lea.hbm %s1038_s4, 256 }
 0x230   : > { %p792_p5 = scmp.ne.s32.totalorder %s988_s21, %s791_s5  ;;  %p796_p9 = scmp.lt.s32.totalorder %s988_s21, %s1038_s4 }
 0x231   : > { %p797_p12 = scmp.lt.s32.totalorder %s795_s7, %s791_s5 }
 0x232   : > { %p793_p6 = pnand %p792_p5, %p936_p4 }
 0x233   : > { %p798_p10 = por %p797_p12, %p796_p9 }
 0x234   : > { %p794_p7 = pneg %p793_p6 }
 0x236   : > { %p799_p11 = pnand %p798_p10, %p794_p7 }
 0x238   : > { %802 = shalt.err (!%p799_p11)
}
 0x239   : > { %657 = dma.vmem_to_hbm [thread:$0]  (%p936_p4), %s990_s12, 128, %s988_s21, %s478_s18  }
 0x23a PF: > { %p669_p13 = scmp.ge.s32.totalorder %s857_s20, 2  ;;  %s504_s10 = sand.u32 1, %s837_s15  }
 0x23b   : > { %s505_s11 = scalar_lea.sflag [#allocation4], %s504_s10 }
 0x23c   : > { %p664_p0 = pnand %p669_p13, %p943_p8 }
 0x23e   : > { %p665_p1 = pneg %p664_p0 }
 0x240   : > { %832 = dma.done.wait (%p665_p1), %s505_s11, 128  }
 0x241   : > { %834 = vsyncadd (%p665_p1), %s505_s11, 4294967168  ;;  %s18_s20 = sadd.s32 1, %s857_s20   ;;  %s1043_s15 = smov %s841_s16 }
 0x242   : > { %p15_p2 = scmp.ge.s32.totalorder %s18_s20, 4   ;;  %s1044_s16 = smov %s845_s17 }
 0x243   : > { %s1045_s17 = smov %s949_s28  ;;  %s1046_s18 = smov %s853_s19 }
 0x244   : > { %s1047_s19 = smov %s1049_s23  ;;  %17 = sbr.rel (!%p15_p2) target bundleno = 5 (0x5), region = 83 }
 0x249   :  { %510 = vsyncpa [#allocation3], 1 }
 0x24a   :  { %512 = vsyncpa [#allocation3 + $0x1], 1 }
 0x24b   :  { %513 = vsyncpa [#allocation4], 1 }
 0x24c   :  { %515 = vsyncpa [#allocation4 + $0x1], 1 }

</bundles_post_ra>
